<compile_context>
chip_gen: v7x
topology: tpu7x:2x2x1
jax: 0.10.0
libtpu: 0.0.40
codegen_flags: <defaults>
</compile_context>

<pallas_src>
import functools

import jax
import jax.numpy as jnp
import numpy as np
from jax import lax
from jax.experimental import pallas as pl
from jax.experimental.pallas import tpu as pltpu


def lstm1_kernel(x_ref, wih_ref, whh_ref, b_ref, wfc_ref, bfc_ref, out_ref, *,
                 seq_len, batch):
    """x_ref: (T*B, I) time-major-flattened input; weights pre-transposed.

    Packed gate order is [i, f, o, g] (sigmoid gates contiguous, tanh gate last).
    """
    T, B = seq_len, batch
    H = whh_ref.shape[0]

    # ---- hoisted input projection: one (T*B, I) x (I, 4H) matmul -----------
    x_proj = (jnp.dot(x_ref[...], wih_ref[...],
                      preferred_element_type=jnp.float32)
              + b_ref[...])                                   # (T*B, 4H)

    whh = whh_ref[...]                                        # (H, 4H), resident

    h = jnp.zeros((B, H), jnp.float32)
    c = jnp.zeros((B, H), jnp.float32)

    # ---- recurrence: fully unrolled static loop, h/c stay in vregs ----------
    for t in range(T):
        # static, sublane-aligned row slice (t*B is a multiple of 8 for B=8)
        gates = x_proj[t * B:(t + 1) * B, :] + jnp.dot(
            h, whh, preferred_element_type=jnp.float32)       # (B, 4H)
        sig = jax.nn.sigmoid(gates[:, :3 * H])                # [i | f | o]
        g_g = jnp.tanh(gates[:, 3 * H:])                      # g
        i_g = sig[:, 0 * H:1 * H]
        f_g = sig[:, 1 * H:2 * H]
        o_g = sig[:, 2 * H:3 * H]
        c = f_g * c + i_g * g_g
        h = o_g * jnp.tanh(c)

    # ---- fused head: ReLU -> Linear -----------------------------------------
    # TODO(synk): if num_classes grows, pad the output lane dim to 128 for a
    # dense vst (negligible at C=4).
    out_ref[...] = (jnp.dot(jax.nn.relu(h), wfc_ref[...],
                            preferred_element_type=jnp.float32)
                    + bfc_ref[...])


def lstm1_forward(x_btI, packed_params):
    """x_btI: (B, T, I) float32, batch_first like the PyTorch module."""
    wih_T, whh_T, b_gates, wfc_T, bfc = packed_params
    B, T, I = x_btI.shape
    H = whh_T.shape[0]
    C = wfc_T.shape[1]

    # time-major, flattened to (T*B, I) so the in-kernel projection is one matmul
    x_2d = jnp.transpose(x_btI, (1, 0, 2)).reshape(T * B, I)

    vmem = pl.BlockSpec(memory_space=pltpu.MemorySpace.VMEM)
    kernel = functools.partial(lstm1_kernel, seq_len=T, batch=B)

    return pl.pallas_call(
        kernel,
        out_shape=jax.ShapeDtypeStruct((B, C), jnp.float32),
        in_specs=[vmem, vmem, vmem, vmem, vmem, vmem],
        out_specs=vmem,
    )(x_2d, wih_T, whh_T, b_gates, wfc_T, bfc)


def init_torch_params(key, input_size, hidden_size, num_classes):
    """Random params with PyTorch LSTM/Linear shapes, gate order [i, f, g, o]."""
    H, I, C = hidden_size, input_size, num_classes
    lim = 1.0 / np.sqrt(H)
    ks = jax.random.split(key, 6)
    u = lambda k, s: jax.random.uniform(k, s, jnp.float32, -lim, lim)
    return {
        "w_ih": u(ks[0], (4 * H, I)),   # (4H, I)
        "w_hh": u(ks[1], (4 * H, H)),   # (4H, H)
        "b_ih": u(ks[2], (4 * H,)),
        "b_hh": u(ks[3], (4 * H,)),
        "w_fc": u(ks[4], (C, H)),       # (C, H)
        "b_fc": u(ks[5], (C,)),
    }


def pack_params(p, hidden_size):
    """PyTorch layout -> kernel layout: reorder gates [i,f,g,o] -> [i,f,o,g],
    transpose for right-multiplication, combine the two gate biases."""
    H = hidden_size
    perm = np.concatenate([np.arange(0, 2 * H),        # i, f
                           np.arange(3 * H, 4 * H),    # o
                           np.arange(2 * H, 3 * H)])   # g
    w_ih = p["w_ih"][perm]                             # (4H, I)
    w_hh = p["w_hh"][perm]                             # (4H, H)
    b = (p["b_ih"] + p["b_hh"])[perm]                  # (4H,)
    return (jnp.asarray(w_ih.T),                       # (I, 4H)
            jnp.asarray(w_hh.T),                       # (H, 4H)
            jnp.asarray(b)[None, :],                   # (1, 4H)
            jnp.asarray(p["w_fc"].T),                  # (H, C)
            jnp.asarray(p["b_fc"])[None, :])           # (1, C)


def reference_forward(x_btI, p):
    """Pure-JAX reference replicating nn.LSTM (PyTorch gate order) -> last step
    -> ReLU -> Linear, using the original PyTorch-shaped parameters."""
    B, T, I = x_btI.shape
    H = p["w_hh"].shape[1]
    wih_T = p["w_ih"].T
    whh_T = p["w_hh"].T
    b = p["b_ih"] + p["b_hh"]

    def step(carry, x_t):
        h, c = carry
        gates = x_t @ wih_T + h @ whh_T + b
        i = jax.nn.sigmoid(gates[:, 0 * H:1 * H])
        f = jax.nn.sigmoid(gates[:, 1 * H:2 * H])
        g = jnp.tanh(gates[:, 2 * H:3 * H])
        o = jax.nn.sigmoid(gates[:, 3 * H:4 * H])
        c_new = f * c + i * g
        h_new = o * jnp.tanh(c_new)
        return (h_new, c_new), None

    h0 = jnp.zeros((B, H), jnp.float32)
    c0 = jnp.zeros((B, H), jnp.float32)
    (h_T, _), _ = lax.scan(step, (h0, c0), jnp.transpose(x_btI, (1, 0, 2)))
    return jax.nn.relu(h_T) @ p["w_fc"].T + p["b_fc"]


if __name__ == "__main__":
    # Small shapes consistent with the module's forward: x is (batch, seq, input_size)
    batch, seq_length, input_size, hidden_size, num_classes = 8, 8, 16, 32, 4

    key = jax.random.PRNGKey(0)
    kx, kp = jax.random.split(key)
    x = jax.random.normal(kx, (batch, seq_length, input_size), jnp.float32)

    torch_params = init_torch_params(kp, input_size, hidden_size, num_classes)
    packed = pack_params(torch_params, hidden_size)

    out = jax.block_until_ready(lstm1_forward(x, packed))

    ref = reference_forward(x, torch_params)
    np.testing.assert_allclose(np.asarray(out), np.asarray(ref), rtol=1e-5, atol=1e-5)

    print("KERNEL_OK")
</pallas_src>

<mosaic_0001>
module attributes {stable_mosaic.version = 11 : i64} {
  func.func @lstm1_kernel(%arg0: memref<64x16xf32, #tpu.memory_space<vmem>>, %arg1: memref<16x128xf32, #tpu.memory_space<vmem>>, %arg2: memref<32x128xf32, #tpu.memory_space<vmem>>, %arg3: memref<1x128xf32, #tpu.memory_space<vmem>>, %arg4: memref<32x4xf32, #tpu.memory_space<vmem>>, %arg5: memref<1x4xf32, #tpu.memory_space<vmem>>, %arg6: memref<8x4xf32, #tpu.memory_space<vmem>>) attributes {dimension_semantics = [], scalar_prefetch = 0 : i64, scratch_operands = 0 : i64, tpu.core_type = #tpu.core_type<tc>} {
    %c0 = arith.constant 0 : index
    %c0_0 = arith.constant 0 : index
    %0 = vector.load %arg0[%c0, %c0_0] : memref<64x16xf32, #tpu.memory_space<vmem>>, vector<64x16xf32>
    %c0_1 = arith.constant 0 : index
    %c0_2 = arith.constant 0 : index
    %1 = vector.load %arg1[%c0_1, %c0_2] : memref<16x128xf32, #tpu.memory_space<vmem>>, vector<16x128xf32>
    %cst = arith.constant dense<0.000000e+00> : vector<64x128xf32>
    %2 = tpu.matmul %0, %1, %cst {dimension_numbers = #tpu.dot_dimension_numbers<[1], [0], [0], [1], [0, 0, 1, 1], [], []>} : vector<64x16xf32>, vector<16x128xf32>, vector<64x128xf32> -> vector<64x128xf32>
    %c0_3 = arith.constant 0 : index
    %c0_4 = arith.constant 0 : index
    %3 = vector.load %arg3[%c0_3, %c0_4] : memref<1x128xf32, #tpu.memory_space<vmem>>, vector<1x128xf32>
    %4 = vector.broadcast %3 : vector<1x128xf32> to vector<64x128xf32>
    %5 = arith.addf %2, %4 : vector<64x128xf32>
    %c0_5 = arith.constant 0 : index
    %c0_6 = arith.constant 0 : index
    %6 = vector.load %arg2[%c0_5, %c0_6] : memref<32x128xf32, #tpu.memory_space<vmem>>, vector<32x128xf32>
    %cst_7 = arith.constant 0.000000e+00 : f32
    %7 = vector.broadcast %cst_7 : f32 to vector<8x32xf32>
    %cst_8 = arith.constant 0.000000e+00 : f32
    %8 = vector.broadcast %cst_8 : f32 to vector<8x32xf32>
    %9 = vector.extract_strided_slice %5 {offsets = [0, 0], sizes = [8, 128], strides = [1, 1]} : vector<64x128xf32> to vector<8x128xf32>
    %cst_9 = arith.constant dense<0.000000e+00> : vector<8x128xf32>
    %10 = tpu.matmul %7, %6, %cst_9 {dimension_numbers = #tpu.dot_dimension_numbers<[1], [0], [0], [1], [0, 0, 1, 1], [], []>} : vector<8x32xf32>, vector<32x128xf32>, vector<8x128xf32> -> vector<8x128xf32>
    %11 = arith.addf %9, %10 : vector<8x128xf32>
    %12 = vector.extract_strided_slice %11 {offsets = [0, 0], sizes = [8, 96], strides = [1, 1]} : vector<8x128xf32> to vector<8x96xf32>
    %13 = arith.negf %12 : vector<8x96xf32>
    %14 = math.exp %13 : vector<8x96xf32>
    %cst_10 = arith.constant 1.000000e+00 : f32
    %15 = vector.broadcast %cst_10 : f32 to vector<8x96xf32>
    %16 = arith.addf %15, %14 : vector<8x96xf32>
    %17 = arith.divf %15, %16 : vector<8x96xf32>
    %18 = vector.extract_strided_slice %11 {offsets = [0, 96], sizes = [8, 32], strides = [1, 1]} : vector<8x128xf32> to vector<8x32xf32>
    %19 = math.tanh %18 : vector<8x32xf32>
    %20 = vector.extract_strided_slice %17 {offsets = [0, 0], sizes = [8, 32], strides = [1, 1]} : vector<8x96xf32> to vector<8x32xf32>
    %21 = vector.extract_strided_slice %17 {offsets = [0, 32], sizes = [8, 32], strides = [1, 1]} : vector<8x96xf32> to vector<8x32xf32>
    %22 = vector.extract_strided_slice %17 {offsets = [0, 64], sizes = [8, 32], strides = [1, 1]} : vector<8x96xf32> to vector<8x32xf32>
    %23 = arith.mulf %21, %8 : vector<8x32xf32>
    %24 = arith.mulf %20, %19 : vector<8x32xf32>
    %25 = arith.addf %23, %24 : vector<8x32xf32>
    %26 = math.tanh %25 : vector<8x32xf32>
    %27 = arith.mulf %22, %26 : vector<8x32xf32>
    %28 = vector.extract_strided_slice %5 {offsets = [8, 0], sizes = [8, 128], strides = [1, 1]} : vector<64x128xf32> to vector<8x128xf32>
    %cst_11 = arith.constant dense<0.000000e+00> : vector<8x128xf32>
    %29 = tpu.matmul %27, %6, %cst_11 {dimension_numbers = #tpu.dot_dimension_numbers<[1], [0], [0], [1], [0, 0, 1, 1], [], []>} : vector<8x32xf32>, vector<32x128xf32>, vector<8x128xf32> -> vector<8x128xf32>
    %30 = arith.addf %28, %29 : vector<8x128xf32>
    %31 = vector.extract_strided_slice %30 {offsets = [0, 0], sizes = [8, 96], strides = [1, 1]} : vector<8x128xf32> to vector<8x96xf32>
    %32 = arith.negf %31 : vector<8x96xf32>
    %33 = math.exp %32 : vector<8x96xf32>
    %cst_12 = arith.constant 1.000000e+00 : f32
    %34 = vector.broadcast %cst_12 : f32 to vector<8x96xf32>
    %35 = arith.addf %34, %33 : vector<8x96xf32>
    %36 = arith.divf %34, %35 : vector<8x96xf32>
    %37 = vector.extract_strided_slice %30 {offsets = [0, 96], sizes = [8, 32], strides = [1, 1]} : vector<8x128xf32> to vector<8x32xf32>
    %38 = math.tanh %37 : vector<8x32xf32>
    %39 = vector.extract_strided_slice %36 {offsets = [0, 0], sizes = [8, 32], strides = [1, 1]} : vector<8x96xf32> to vector<8x32xf32>
    %40 = vector.extract_strided_slice %36 {offsets = [0, 32], sizes = [8, 32], strides = [1, 1]} : vector<8x96xf32> to vector<8x32xf32>
    %41 = vector.extract_strided_slice %36 {offsets = [0, 64], sizes = [8, 32], strides = [1, 1]} : vector<8x96xf32> to vector<8x32xf32>
    %42 = arith.mulf %40, %25 : vector<8x32xf32>
    %43 = arith.mulf %39, %38 : vector<8x32xf32>
    %44 = arith.addf %42, %43 : vector<8x32xf32>
    %45 = math.tanh %44 : vector<8x32xf32>
    %46 = arith.mulf %41, %45 : vector<8x32xf32>
    %47 = vector.extract_strided_slice %5 {offsets = [16, 0], sizes = [8, 128], strides = [1, 1]} : vector<64x128xf32> to vector<8x128xf32>
    %cst_13 = arith.constant dense<0.000000e+00> : vector<8x128xf32>
    %48 = tpu.matmul %46, %6, %cst_13 {dimension_numbers = #tpu.dot_dimension_numbers<[1], [0], [0], [1], [0, 0, 1, 1], [], []>} : vector<8x32xf32>, vector<32x128xf32>, vector<8x128xf32> -> vector<8x128xf32>
    %49 = arith.addf %47, %48 : vector<8x128xf32>
    %50 = vector.extract_strided_slice %49 {offsets = [0, 0], sizes = [8, 96], strides = [1, 1]} : vector<8x128xf32> to vector<8x96xf32>
    %51 = arith.negf %50 : vector<8x96xf32>
    %52 = math.exp %51 : vector<8x96xf32>
    %cst_14 = arith.constant 1.000000e+00 : f32
    %53 = vector.broadcast %cst_14 : f32 to vector<8x96xf32>
    %54 = arith.addf %53, %52 : vector<8x96xf32>
    %55 = arith.divf %53, %54 : vector<8x96xf32>
    %56 = vector.extract_strided_slice %49 {offsets = [0, 96], sizes = [8, 32], strides = [1, 1]} : vector<8x128xf32> to vector<8x32xf32>
    %57 = math.tanh %56 : vector<8x32xf32>
    %58 = vector.extract_strided_slice %55 {offsets = [0, 0], sizes = [8, 32], strides = [1, 1]} : vector<8x96xf32> to vector<8x32xf32>
    %59 = vector.extract_strided_slice %55 {offsets = [0, 32], sizes = [8, 32], strides = [1, 1]} : vector<8x96xf32> to vector<8x32xf32>
    %60 = vector.extract_strided_slice %55 {offsets = [0, 64], sizes = [8, 32], strides = [1, 1]} : vector<8x96xf32> to vector<8x32xf32>
    %61 = arith.mulf %59, %44 : vector<8x32xf32>
    %62 = arith.mulf %58, %57 : vector<8x32xf32>
    %63 = arith.addf %61, %62 : vector<8x32xf32>
    %64 = math.tanh %63 : vector<8x32xf32>
    %65 = arith.mulf %60, %64 : vector<8x32xf32>
    %66 = vector.extract_strided_slice %5 {offsets = [24, 0], sizes = [8, 128], strides = [1, 1]} : vector<64x128xf32> to vector<8x128xf32>
    %cst_15 = arith.constant dense<0.000000e+00> : vector<8x128xf32>
    %67 = tpu.matmul %65, %6, %cst_15 {dimension_numbers = #tpu.dot_dimension_numbers<[1], [0], [0], [1], [0, 0, 1, 1], [], []>} : vector<8x32xf32>, vector<32x128xf32>, vector<8x128xf32> -> vector<8x128xf32>
    %68 = arith.addf %66, %67 : vector<8x128xf32>
    %69 = vector.extract_strided_slice %68 {offsets = [0, 0], sizes = [8, 96], strides = [1, 1]} : vector<8x128xf32> to vector<8x96xf32>
    %70 = arith.negf %69 : vector<8x96xf32>
    %71 = math.exp %70 : vector<8x96xf32>
    %cst_16 = arith.constant 1.000000e+00 : f32
    %72 = vector.broadcast %cst_16 : f32 to vector<8x96xf32>
    %73 = arith.addf %72, %71 : vector<8x96xf32>
    %74 = arith.divf %72, %73 : vector<8x96xf32>
    %75 = vector.extract_strided_slice %68 {offsets = [0, 96], sizes = [8, 32], strides = [1, 1]} : vector<8x128xf32> to vector<8x32xf32>
    %76 = math.tanh %75 : vector<8x32xf32>
    %77 = vector.extract_strided_slice %74 {offsets = [0, 0], sizes = [8, 32], strides = [1, 1]} : vector<8x96xf32> to vector<8x32xf32>
    %78 = vector.extract_strided_slice %74 {offsets = [0, 32], sizes = [8, 32], strides = [1, 1]} : vector<8x96xf32> to vector<8x32xf32>
    %79 = vector.extract_strided_slice %74 {offsets = [0, 64], sizes = [8, 32], strides = [1, 1]} : vector<8x96xf32> to vector<8x32xf32>
    %80 = arith.mulf %78, %63 : vector<8x32xf32>
    %81 = arith.mulf %77, %76 : vector<8x32xf32>
    %82 = arith.addf %80, %81 : vector<8x32xf32>
    %83 = math.tanh %82 : vector<8x32xf32>
    %84 = arith.mulf %79, %83 : vector<8x32xf32>
    %85 = vector.extract_strided_slice %5 {offsets = [32, 0], sizes = [8, 128], strides = [1, 1]} : vector<64x128xf32> to vector<8x128xf32>
    %cst_17 = arith.constant dense<0.000000e+00> : vector<8x128xf32>
    %86 = tpu.matmul %84, %6, %cst_17 {dimension_numbers = #tpu.dot_dimension_numbers<[1], [0], [0], [1], [0, 0, 1, 1], [], []>} : vector<8x32xf32>, vector<32x128xf32>, vector<8x128xf32> -> vector<8x128xf32>
    %87 = arith.addf %85, %86 : vector<8x128xf32>
    %88 = vector.extract_strided_slice %87 {offsets = [0, 0], sizes = [8, 96], strides = [1, 1]} : vector<8x128xf32> to vector<8x96xf32>
    %89 = arith.negf %88 : vector<8x96xf32>
    %90 = math.exp %89 : vector<8x96xf32>
    %cst_18 = arith.constant 1.000000e+00 : f32
    %91 = vector.broadcast %cst_18 : f32 to vector<8x96xf32>
    %92 = arith.addf %91, %90 : vector<8x96xf32>
    %93 = arith.divf %91, %92 : vector<8x96xf32>
    %94 = vector.extract_strided_slice %87 {offsets = [0, 96], sizes = [8, 32], strides = [1, 1]} : vector<8x128xf32> to vector<8x32xf32>
    %95 = math.tanh %94 : vector<8x32xf32>
    %96 = vector.extract_strided_slice %93 {offsets = [0, 0], sizes = [8, 32], strides = [1, 1]} : vector<8x96xf32> to vector<8x32xf32>
    %97 = vector.extract_strided_slice %93 {offsets = [0, 32], sizes = [8, 32], strides = [1, 1]} : vector<8x96xf32> to vector<8x32xf32>
    %98 = vector.extract_strided_slice %93 {offsets = [0, 64], sizes = [8, 32], strides = [1, 1]} : vector<8x96xf32> to vector<8x32xf32>
    %99 = arith.mulf %97, %82 : vector<8x32xf32>
    %100 = arith.mulf %96, %95 : vector<8x32xf32>
    %101 = arith.addf %99, %100 : vector<8x32xf32>
    %102 = math.tanh %101 : vector<8x32xf32>
    %103 = arith.mulf %98, %102 : vector<8x32xf32>
    %104 = vector.extract_strided_slice %5 {offsets = [40, 0], sizes = [8, 128], strides = [1, 1]} : vector<64x128xf32> to vector<8x128xf32>
    %cst_19 = arith.constant dense<0.000000e+00> : vector<8x128xf32>
    %105 = tpu.matmul %103, %6, %cst_19 {dimension_numbers = #tpu.dot_dimension_numbers<[1], [0], [0], [1], [0, 0, 1, 1], [], []>} : vector<8x32xf32>, vector<32x128xf32>, vector<8x128xf32> -> vector<8x128xf32>
    %106 = arith.addf %104, %105 : vector<8x128xf32>
    %107 = vector.extract_strided_slice %106 {offsets = [0, 0], sizes = [8, 96], strides = [1, 1]} : vector<8x128xf32> to vector<8x96xf32>
    %108 = arith.negf %107 : vector<8x96xf32>
    %109 = math.exp %108 : vector<8x96xf32>
    %cst_20 = arith.constant 1.000000e+00 : f32
    %110 = vector.broadcast %cst_20 : f32 to vector<8x96xf32>
    %111 = arith.addf %110, %109 : vector<8x96xf32>
    %112 = arith.divf %110, %111 : vector<8x96xf32>
    %113 = vector.extract_strided_slice %106 {offsets = [0, 96], sizes = [8, 32], strides = [1, 1]} : vector<8x128xf32> to vector<8x32xf32>
    %114 = math.tanh %113 : vector<8x32xf32>
    %115 = vector.extract_strided_slice %112 {offsets = [0, 0], sizes = [8, 32], strides = [1, 1]} : vector<8x96xf32> to vector<8x32xf32>
    %116 = vector.extract_strided_slice %112 {offsets = [0, 32], sizes = [8, 32], strides = [1, 1]} : vector<8x96xf32> to vector<8x32xf32>
    %117 = vector.extract_strided_slice %112 {offsets = [0, 64], sizes = [8, 32], strides = [1, 1]} : vector<8x96xf32> to vector<8x32xf32>
    %118 = arith.mulf %116, %101 : vector<8x32xf32>
    %119 = arith.mulf %115, %114 : vector<8x32xf32>
    %120 = arith.addf %118, %119 : vector<8x32xf32>
    %121 = math.tanh %120 : vector<8x32xf32>
    %122 = arith.mulf %117, %121 : vector<8x32xf32>
    %123 = vector.extract_strided_slice %5 {offsets = [48, 0], sizes = [8, 128], strides = [1, 1]} : vector<64x128xf32> to vector<8x128xf32>
    %cst_21 = arith.constant dense<0.000000e+00> : vector<8x128xf32>
    %124 = tpu.matmul %122, %6, %cst_21 {dimension_numbers = #tpu.dot_dimension_numbers<[1], [0], [0], [1], [0, 0, 1, 1], [], []>} : vector<8x32xf32>, vector<32x128xf32>, vector<8x128xf32> -> vector<8x128xf32>
    %125 = arith.addf %123, %124 : vector<8x128xf32>
    %126 = vector.extract_strided_slice %125 {offsets = [0, 0], sizes = [8, 96], strides = [1, 1]} : vector<8x128xf32> to vector<8x96xf32>
    %127 = arith.negf %126 : vector<8x96xf32>
    %128 = math.exp %127 : vector<8x96xf32>
    %cst_22 = arith.constant 1.000000e+00 : f32
    %129 = vector.broadcast %cst_22 : f32 to vector<8x96xf32>
    %130 = arith.addf %129, %128 : vector<8x96xf32>
    %131 = arith.divf %129, %130 : vector<8x96xf32>
    %132 = vector.extract_strided_slice %125 {offsets = [0, 96], sizes = [8, 32], strides = [1, 1]} : vector<8x128xf32> to vector<8x32xf32>
    %133 = math.tanh %132 : vector<8x32xf32>
    %134 = vector.extract_strided_slice %131 {offsets = [0, 0], sizes = [8, 32], strides = [1, 1]} : vector<8x96xf32> to vector<8x32xf32>
    %135 = vector.extract_strided_slice %131 {offsets = [0, 32], sizes = [8, 32], strides = [1, 1]} : vector<8x96xf32> to vector<8x32xf32>
    %136 = vector.extract_strided_slice %131 {offsets = [0, 64], sizes = [8, 32], strides = [1, 1]} : vector<8x96xf32> to vector<8x32xf32>
    %137 = arith.mulf %135, %120 : vector<8x32xf32>
    %138 = arith.mulf %134, %133 : vector<8x32xf32>
    %139 = arith.addf %137, %138 : vector<8x32xf32>
    %140 = math.tanh %139 : vector<8x32xf32>
    %141 = arith.mulf %136, %140 : vector<8x32xf32>
    %142 = vector.extract_strided_slice %5 {offsets = [56, 0], sizes = [8, 128], strides = [1, 1]} : vector<64x128xf32> to vector<8x128xf32>
    %cst_23 = arith.constant dense<0.000000e+00> : vector<8x128xf32>
    %143 = tpu.matmul %141, %6, %cst_23 {dimension_numbers = #tpu.dot_dimension_numbers<[1], [0], [0], [1], [0, 0, 1, 1], [], []>} : vector<8x32xf32>, vector<32x128xf32>, vector<8x128xf32> -> vector<8x128xf32>
    %144 = arith.addf %142, %143 : vector<8x128xf32>
    %145 = vector.extract_strided_slice %144 {offsets = [0, 0], sizes = [8, 96], strides = [1, 1]} : vector<8x128xf32> to vector<8x96xf32>
    %146 = arith.negf %145 : vector<8x96xf32>
    %147 = math.exp %146 : vector<8x96xf32>
    %cst_24 = arith.constant 1.000000e+00 : f32
    %148 = vector.broadcast %cst_24 : f32 to vector<8x96xf32>
    %149 = arith.addf %148, %147 : vector<8x96xf32>
    %150 = arith.divf %148, %149 : vector<8x96xf32>
    %151 = vector.extract_strided_slice %144 {offsets = [0, 96], sizes = [8, 32], strides = [1, 1]} : vector<8x128xf32> to vector<8x32xf32>
    %152 = math.tanh %151 : vector<8x32xf32>
    %153 = vector.extract_strided_slice %150 {offsets = [0, 0], sizes = [8, 32], strides = [1, 1]} : vector<8x96xf32> to vector<8x32xf32>
    %154 = vector.extract_strided_slice %150 {offsets = [0, 32], sizes = [8, 32], strides = [1, 1]} : vector<8x96xf32> to vector<8x32xf32>
    %155 = vector.extract_strided_slice %150 {offsets = [0, 64], sizes = [8, 32], strides = [1, 1]} : vector<8x96xf32> to vector<8x32xf32>
    %156 = arith.mulf %154, %139 : vector<8x32xf32>
    %157 = arith.mulf %153, %152 : vector<8x32xf32>
    %158 = arith.addf %156, %157 : vector<8x32xf32>
    %159 = math.tanh %158 : vector<8x32xf32>
    %160 = arith.mulf %155, %159 : vector<8x32xf32>
    %cst_25 = arith.constant 0.000000e+00 : f32
    %161 = vector.broadcast %cst_25 : f32 to vector<8x32xf32>
    %162 = arith.maximumf %160, %161 : vector<8x32xf32>
    %c0_26 = arith.constant 0 : index
    %c0_27 = arith.constant 0 : index
    %163 = vector.load %arg4[%c0_26, %c0_27] : memref<32x4xf32, #tpu.memory_space<vmem>>, vector<32x4xf32>
    %cst_28 = arith.constant dense<0.000000e+00> : vector<8x4xf32>
    %164 = tpu.matmul %162, %163, %cst_28 {dimension_numbers = #tpu.dot_dimension_numbers<[1], [0], [0], [1], [0, 0, 1, 1], [], []>} : vector<8x32xf32>, vector<32x4xf32>, vector<8x4xf32> -> vector<8x4xf32>
    %c0_29 = arith.constant 0 : index
    %c0_30 = arith.constant 0 : index
    %165 = vector.load %arg5[%c0_29, %c0_30] : memref<1x4xf32, #tpu.memory_space<vmem>>, vector<1x4xf32>
    %166 = vector.broadcast %165 : vector<1x4xf32> to vector<8x4xf32>
    %167 = arith.addf %164, %166 : vector<8x4xf32>
    %c0_31 = arith.constant 0 : index
    %c0_32 = arith.constant 0 : index
    %168 = vector.load %arg6[%c0_31, %c0_32] : memref<8x4xf32, #tpu.memory_space<vmem>>, vector<8x4xf32>
    tpu.vector_store %arg6[%c0_31, %c0_32], %167 {strides = array<i32>} : memref<8x4xf32, #tpu.memory_space<vmem>>, vector<8x4xf32>,
    return
  }
}

</mosaic_0001>

<bundles_post_ra>
// kernel: tpu_custom_call.1
= control target key start
LH: loop header
LB: loop body
LE: loop exit
PB: predicated region body
PF: predicated region fallthrough
CT: control target
= control target key end

     0   :  { %vm40_vm0 = vcmask 130048   ;;  %v1389_v0 = vmov 0.0|0.0   ;;  %vm1390_vm1 = vmmov 0   ;;  %v1391_v4 = vmov 0.0   ;;  %s1392_s13 = smov 32   ;;  %s1619_s1 = inlined_call_operand.vmem [shape: f32[16,128], index: 1, kind: input, shape index: {}]   ;;  %s1620_s2 = inlined_call_operand.vmem [shape: f32[32,128], index: 2, kind: input, shape index: {}]   ;;  %s1621_s0 = inlined_call_operand.vmem [shape: f32[64,16], index: 0, kind: input, shape index: {}]   ;;  %s1622_s3 = inlined_call_operand.vmem [shape: f32[1,128], index: 3, kind: input, shape index: {}]   ;;  %s1623_s4 = inlined_call_operand.vmem [shape: f32[32,4], index: 4, kind: input, shape index: {}]   ;;  %s1624_s5 = inlined_call_operand.vmem [shape: f32[1,4], index: 5, kind: input, shape index: {}]   ;;  %s1625_s6 = inlined_call_operand.vmem [shape: f32[8,4], index: 6, kind: output, shape index: {}]  }
   0x1   :  { %1266 = vmatprep.subr.bf16.mxu1 %v1389_v0  ;;  %v31_v1 = vld [vmem:[%s1619_s1] sm:$0xff]  ;;  %v32_v2 = vld [vmem:[%s1619_s1 + $0x8] sm:$0xff]  ;;  %1171 = vmatprep.mubr.msk.f32.mxu1 %vm1390_vm1, %v1391_v4  ;;  %v172_v9 = vld [vmem:[%s1620_s2 + $0x10] sm:$0xff]  ;;  %vm174_vm2 = vcmask 261120   ;;  %vm1060_vm3 = vcmask 31744  }
   0x2   :  { %v170_v3 = vld [vmem:[%s1620_s2] sm:$0xff]  ;;  %v1262_v5 = vpack.c.bf16 %v32_v2, %v31_v1  ;;  %v171_v6 = vld [vmem:[%s1620_s2 + $0x8] sm:$0xff]  ;;  %v173_v10 = vld [vmem:[%s1620_s2 + $0x18] sm:$0xff] }
   0x3   :  { %v23_v7 = vld [vmem:[%s1621_s0] sm:$0xff]  ;;  %v1447_v8 = vpack.c.bf16 %v171_v6, %v170_v3  ;;  %v24_v11 = vld [vmem:[%s1621_s0 + $0x8] sm:$0xff]  ;;  %v1460_v12 = vpack.c.bf16 %v173_v10, %v172_v9  ;;  %v25_v48 = vld [vmem:[%s1621_s0 + $0x10] sm:$0xff] }
   0x4   :  { %1151 = vmatprep.mubr.msk.f32.mxu0 %vm40_vm0, %v23_v7  ;;  %1263 = vmatprep.subr.bf16.mxu0 %v1262_v5  ;;  %v1481_v13 = vld [vmem:[%s1622_s3] ss:$0 sm:$0xff]  ;;  %s1393_s3 = smov 64   ;;  %v26_v49 = vld [vmem:[%s1621_s0 + $0x18] sm:$0xff]  ;;  %v28_v51 = vld [vmem:[%s1621_s0 + $0x28] sm:$0xff] }
   0x5   :  { %1268 = vmatpush3.bf16.msra.mxu1 %v1447_v8  ;;  %1265 = vmatpush3.bf16.msra.mxu0 %v1262_v5  ;;  %v27_v50 = vld [vmem:[%s1621_s0 + $0x20] sm:$0xff]  ;;  %v29_v52 = vld [vmem:[%s1621_s0 + $0x30] sm:$0xff]  ;;  %v30_v53 = vld [vmem:[%s1621_s0 + $0x38] sm:$0xff] }
   0x6   :  { %1269 = vmatprep.subr.bf16.mxu1 %v1389_v0  ;;  %1278 = vmatprep.subr.bf16.mxu0 %v1389_v0 }
   0x8   :  { %1152 = vmatmul.mubr.msk.f32.vlgmr.msra.gmra.mrb[0].mxu0 %vm40_vm0, %v24_v11 }
   0x9   :  { %1271 = vmatpush3.bf16.msra.mxu1 %v1460_v12  ;;  %1280 = vmatpush3.bf16.msra.mxu0 %v1447_v8 }
   0xa   :  { %1272 = vmatprep.subr.bf16.mxu1 %v1389_v0  ;;  %1281 = vmatprep.subr.bf16.mxu0 %v1389_v0 }
   0xb   :  { %1154 = vmatprep.mubr.msk.f32.mxu0 %vm40_vm0, %v25_v48 }
   0xc   :  { %1172 = vmatmul.mubr.f32.vlgmr.msra.gmra.mrb[0].mxu1 %v1391_v4  ;;  %1155 = vmatmul.mubr.msk.f32.gmra.mrb[2].mxu0 %vm40_vm0, %v26_v49 }
   0xd   :  { %1274 = vmatpush3.bf16.msra.mxu1 %v1447_v8  ;;  %1182 = vmatprep.mubr.msk.f32.mxu1 %vm1390_vm1, %v1391_v4 }
   0xe   :  { %1275 = vmatprep.subr.bf16.mxu1 %v1389_v0  ;;  %1283 = vmatpush3.bf16.msra.mxu0 %v1460_v12 }
   0xf   :  { %1290 = vmatprep.subr.bf16.mxu0 %v1389_v0  ;;  %1157 = vmatprep.mubr.msk.f32.mxu0 %vm40_vm0, %v27_v50 }
  0x10   :  { %1158 = vmatmul.mubr.msk.f32.gmra.mrb[4].mxu0 %vm40_vm0, %v28_v51 }
  0x11   :  { %1277 = vmatpush3.bf16.msra.mxu1 %v1460_v12  ;;  %1160 = vmatprep.mubr.msk.f32.mxu0 %vm40_vm0, %v29_v52 }
  0x12   :  { %1284 = vmatprep.subr.bf16.mxu1 %v1389_v0 }
  0x14   :  { %1161 = vmatmul.mubr.msk.f32.gmra.mrb[6].mxu0 %vm40_vm0, %v30_v53 }
  0x15   :  { %1193 = vmatprep.mubr.msk.f32.mxu0 %vm1390_vm1, %v1391_v4 }
  0xdb   :  { %v1153_v14 = vpop.f32.mrb[0].mxu0 }
  0xdc   :  { %v131_v15 = vpop.f32.mrb[1].mxu0  ;;  %v137_v34 = vadd.f32 %v1153_v14, %v1481_v13 }
  0xdd   :  { %v132_v16 = vadd.f32 %v1481_v13, %v131_v15 }
  0xdf   :  { %v244_v17 = vpop.f32.mrb[0].mxu1  ;;  %v1156_v57 = vpop.f32.mrb[2].mxu0 }
  0xe0   :  { %v248_v18 = vadd.f32 %v244_v17, %v132_v16  ;;  %v1173_v19 = vpop.f32.mrb[1].mxu1  ;;  %v141_v58 = vpop.f32.mrb[3].mxu0 }
  0xe1   :  { %v142_v1 = vadd.f32 %v1481_v13, %v141_v58 }
  0xe2   :  { %1325 = vtanh.f32 %v248_v18  ;;  %v1075_v21 = vmul.f32 -1.442695, %v248_v18 }
  0xe3   :  { %v1526_v59 = vpop.f32.mrb[4].mxu0 }
  0xe4   :  { %1327 = vpow2.f32 %v1075_v21  ;;  %v1528_v60 = vpop.f32.mrb[5].mxu0 }
  0xe7   :  { %v1530_v61 = vpop.f32.mrb[6].mxu0 }
  0xe8   :  { %v1532_v62 = vpop.f32.mrb[7].mxu0 }
  0xec   :  { %v1326_v20 = vpop.eup %1325 }
  0xed   :  { %258 = vrot.lane.b32.xlu0 %v1326_v20, %s1392_s13 }
  0xee   :  { %v1328_v22 = vpop.eup %1327 }
  0xef   :  { %v252_v23 = vadd.f32 1.0, %v1328_v22 }
  0xf1   :  { %1329 = vrcp.f32 %v252_v23  ;;  %v147_v23 = vadd.f32 %v1156_v57, %v1481_v13 }
  0xfb   :  { %v1330_v24 = vpop.eup %1329 }
  0xfc   :  { %v256_v27 = vmul.f32 0.0, %v1330_v24 }
 0x15f   :  { %v259_v25 = vpop.permute.xlu0 %258 }
 0x160   :  { %v261_v26 = vmul.f32 %v1330_v24, %v259_v25 }
 0x162   :  { %263 = vrot.lane.b32.xlu0 %v261_v26, %s1392_s13 }
 0x1d4   :  { %v264_v28 = vpop.permute.xlu0 %263 }
 0x1d5   :  { %v266_v29 = vadd.f32 %v264_v28, %v256_v27 }
 0x1d7   :  { %1331 = vtanh.f32 %v266_v29 }
 0x1e1   :  { %v1332_v30 = vpop.eup %1331 }
 0x1e2   :  { %269 = vrot.lane.b32.xlu1 %v1332_v30, %s1392_s13 }
 0x254   :  { %v270_v31 = vpop.permute.xlu1 %269 }
 0x255   :  { %v272_v32 = vmul.f32 %v1330_v24, %v270_v31 }
 0x257   :  { %274 = vrot.lane.b32.xlu1 %v272_v32, %s1393_s3 }
 0x2c9   :  { %v275_v33 = vpop.permute.xlu1 %274 }
 0x2ca   :  { %1183 = vmatmul.mubr.msk.f32.vlgmr.msra.gmra.mrb[2].mxu1 %vm174_vm2, %v275_v33 }
 0x2cb   :  { %1286 = vmatpush3.bf16.msra.mxu1 %v1447_v8  ;;  %1204 = vmatprep.mubr.msk.f32.mxu1 %vm1390_vm1, %v1391_v4 }
 0x2cc   :  { %1287 = vmatprep.subr.bf16.mxu1 %v1389_v0 }
 0x2cf   :  { %1289 = vmatpush3.bf16.msra.mxu1 %v1460_v12 }
 0x2d0   :  { %1296 = vmatprep.subr.bf16.mxu1 %v1389_v0 }
 0x39d   :  { %v344_v35 = vpop.f32.mrb[2].mxu1 }
 0x39e   :  { %v348_v36 = vadd.f32 %v344_v35, %v137_v34  ;;  %v1184_v37 = vpop.f32.mrb[3].mxu1 }
 0x3a0   :  { %1333 = vtanh.f32 %v348_v36  ;;  %v1077_v39 = vmul.f32 -1.442695, %v348_v36 }
 0x3a2   :  { %1335 = vpow2.f32 %v1077_v39 }
 0x3aa   :  { %v1334_v38 = vpop.eup %1333 }
 0x3ab   :  { %358 = vrot.lane.b32.xlu0 %v1334_v38, %s1392_s13 }
 0x3ac   :  { %v1336_v40 = vpop.eup %1335 }
 0x3ad   :  { %v352_v41 = vadd.f32 1.0, %v1336_v40 }
 0x3af   :  { %1337 = vrcp.f32 %v352_v41  ;;  %v152_v41 = vadd.f32 %v1481_v13, %v1528_v60  ;;  %v157_v60 = vadd.f32 %v1526_v59, %v1481_v13 }
 0x3b9   :  { %v1338_v42 = vpop.eup %1337 }
 0x3ba   :  { %v356_v45 = vmul.f32 %v1338_v42, %v266_v29 }
 0x41d   :  { %v359_v43 = vpop.permute.xlu0 %358 }
 0x41e   :  { %v361_v44 = vmul.f32 %v1338_v42, %v359_v43 }
 0x420   :  { %363 = vrot.lane.b32.xlu1 %v361_v44, %s1392_s13 }
 0x492   :  { %v364_v46 = vpop.permute.xlu1 %363 }
 0x493   :  { %v366_v47 = vadd.f32 %v364_v46, %v356_v45 }
 0x495   :  { %1339 = vtanh.f32 %v366_v47 }
 0x49f   :  { %v1340_v54 = vpop.eup %1339 }
 0x4a0   :  { %369 = vrot.lane.b32.xlu0 %v1340_v54, %s1392_s13 }
 0x512   :  { %v370_v55 = vpop.permute.xlu0 %369 }
 0x513   :  { %v372_v56 = vmul.f32 %v1338_v42, %v370_v55 }
 0x515   :  { %374 = vrot.lane.b32.xlu1 %v372_v56, %s1393_s3 }
 0x587   :  { %v375_v63 = vpop.permute.xlu1 %374 }
 0x588   :  { %1194 = vmatmul.mubr.msk.f32.vlgmr.msra.gmra.mrb[8].mxu0 %vm174_vm2, %v375_v63 }
 0x589   :  { %1292 = vmatpush3.bf16.msra.mxu0 %v1447_v8  ;;  %1215 = vmatprep.mubr.msk.f32.mxu0 %vm1390_vm1, %v1391_v4 }
 0x58a   :  { %1293 = vmatprep.subr.bf16.mxu0 %v1389_v0 }
 0x58d   :  { %1295 = vmatpush3.bf16.msra.mxu0 %v1460_v12 }
 0x58e   :  { %1302 = vmatprep.subr.bf16.mxu0 %v1389_v0 }
 0x65b   :  { %v444_v2 = vpop.f32.mrb[8].mxu0 }
 0x65c   :  { %v448_v3 = vadd.f32 %v444_v2, %v142_v1  ;;  %v1195_v5 = vpop.f32.mrb[9].mxu0 }
 0x65e   :  { %1341 = vtanh.f32 %v448_v3  ;;  %v1079_v7 = vmul.f32 -1.442695, %v448_v3 }
 0x660   :  { %1343 = vpow2.f32 %v1079_v7 }
 0x668   :  { %v1342_v6 = vpop.eup %1341 }
 0x669   :  { %458 = vrot.lane.b32.xlu0 %v1342_v6, %s1392_s13 }
 0x66a   :  { %v1344_v9 = vpop.eup %1343 }
 0x66b   :  { %v452_v10 = vadd.f32 1.0, %v1344_v9 }
 0x66d   :  { %1345 = vrcp.f32 %v452_v10 }
 0x677   :  { %v1346_v11 = vpop.eup %1345 }
 0x678   :  { %v456_v16 = vmul.f32 %v1346_v11, %v366_v47 }
 0x6db   :  { %v459_v14 = vpop.permute.xlu0 %458 }
 0x6dc   :  { %v461_v15 = vmul.f32 %v1346_v11, %v459_v14 }
 0x6de   :  { %463 = vrot.lane.b32.xlu1 %v461_v15, %s1392_s13 }
 0x750   :  { %v464_v17 = vpop.permute.xlu1 %463 }
 0x751   :  { %v466_v18 = vadd.f32 %v464_v17, %v456_v16 }
 0x753   :  { %1347 = vtanh.f32 %v466_v18 }
 0x75d   :  { %v1348_v19 = vpop.eup %1347 }
 0x75e   :  { %469 = vrot.lane.b32.xlu0 %v1348_v19, %s1392_s13 }
 0x7d0   :  { %v470_v20 = vpop.permute.xlu0 %469 }
 0x7d1   :  { %v472_v21 = vmul.f32 %v1346_v11, %v470_v20 }
 0x7d3   :  { %474 = vrot.lane.b32.xlu1 %v472_v21, %s1393_s3 }
 0x845   :  { %v475_v22 = vpop.permute.xlu1 %474 }
 0x846   :  { %1205 = vmatmul.mubr.msk.f32.vlgmr.msra.gmra.mrb[4].mxu1 %vm174_vm2, %v475_v22 }
 0x847   :  { %1298 = vmatpush3.bf16.msra.mxu1 %v1447_v8  ;;  %1226 = vmatprep.mubr.msk.f32.mxu1 %vm1390_vm1, %v1391_v4 }
 0x848   :  { %1299 = vmatprep.subr.bf16.mxu1 %v1389_v0 }
 0x84b   :  { %1301 = vmatpush3.bf16.msra.mxu1 %v1460_v12 }
 0x84c   :  { %1308 = vmatprep.subr.bf16.mxu1 %v1389_v0 }
 0x919   :  { %v544_v24 = vpop.f32.mrb[4].mxu1 }
 0x91a   :  { %v548_v25 = vadd.f32 %v544_v24, %v147_v23  ;;  %v1206_v26 = vpop.f32.mrb[5].mxu1 }
 0x91c   :  { %1349 = vtanh.f32 %v548_v25  ;;  %v1081_v28 = vmul.f32 -1.442695, %v548_v25 }
 0x91e   :  { %1351 = vpow2.f32 %v1081_v28 }
 0x926   :  { %v1350_v27 = vpop.eup %1349 }
 0x927   :  { %558 = vrot.lane.b32.xlu0 %v1350_v27, %s1392_s13 }
 0x928   :  { %v1352_v29 = vpop.eup %1351 }
 0x929   :  { %v552_v30 = vadd.f32 1.0, %v1352_v29 }
 0x92b   :  { %1353 = vrcp.f32 %v552_v30 }
 0x935   :  { %v1354_v31 = vpop.eup %1353 }
 0x936   :  { %v556_v34 = vmul.f32 %v1354_v31, %v466_v18  ;;  %v162_v18 = vadd.f32 %v1481_v13, %v1532_v62 }
 0x999   :  { %v559_v32 = vpop.permute.xlu0 %558 }
 0x99a   :  { %v561_v33 = vmul.f32 %v1354_v31, %v559_v32 }
 0x99c   :  { %563 = vrot.lane.b32.xlu1 %v561_v33, %s1392_s13 }
 0xa0e   :  { %v564_v35 = vpop.permute.xlu1 %563 }
 0xa0f   :  { %v566_v36 = vadd.f32 %v564_v35, %v556_v34  ;;  %v167_v34 = vadd.f32 %v1530_v61, %v1481_v13  ;;  %v974_v61 = vld [vmem:[%s1623_s4] sm:$0xff] }
 0xa11   :  { %1355 = vtanh.f32 %v566_v36 }
 0xa1b   :  { %v1356_v37 = vpop.eup %1355 }
 0xa1c   :  { %569 = vrot.lane.b32.xlu0 %v1356_v37, %s1392_s13 }
 0xa8e   :  { %v570_v38 = vpop.permute.xlu0 %569 }
 0xa8f   :  { %v572_v39 = vmul.f32 %v1354_v31, %v570_v38 }
 0xa91   :  { %574 = vrot.lane.b32.xlu1 %v572_v39, %s1393_s3 }
 0xb03   :  { %v575_v40 = vpop.permute.xlu1 %574 }
 0xb04   :  { %1216 = vmatmul.mubr.msk.f32.vlgmr.msra.gmra.mrb[10].mxu0 %vm174_vm2, %v575_v40 }
 0xb05   :  { %1304 = vmatpush3.bf16.msra.mxu0 %v1447_v8  ;;  %1237 = vmatprep.mubr.msk.f32.mxu0 %vm1390_vm1, %v1391_v4 }
 0xb06   :  { %1305 = vmatprep.subr.bf16.mxu0 %v1389_v0 }
 0xb09   :  { %1307 = vmatpush3.bf16.msra.mxu0 %v1460_v12 }
 0xb0a   :  { %1314 = vmatprep.subr.bf16.mxu0 %v1389_v0 }
 0xbd7   :  { %v644_v42 = vpop.f32.mrb[10].mxu0 }
 0xbd8   :  { %v648_v43 = vadd.f32 %v644_v42, %v152_v41  ;;  %v1217_v44 = vpop.f32.mrb[11].mxu0 }
 0xbda   :  { %1357 = vtanh.f32 %v648_v43  ;;  %v1083_v46 = vmul.f32 -1.442695, %v648_v43 }
 0xbdc   :  { %1359 = vpow2.f32 %v1083_v46 }
 0xbe4   :  { %v1358_v45 = vpop.eup %1357 }
 0xbe5   :  { %658 = vrot.lane.b32.xlu0 %v1358_v45, %s1392_s13 }
 0xbe6   :  { %v1360_v47 = vpop.eup %1359 }
 0xbe7   :  { %v652_v48 = vadd.f32 1.0, %v1360_v47  ;;  %v975_v47 = vld [vmem:[%s1623_s4 + $0x8] sm:$0xff] }
 0xbe9   :  { %1361 = vrcp.f32 %v652_v48  ;;  %v976_v48 = vld [vmem:[%s1623_s4 + $0x10] sm:$0xff] }
 0xbf3   :  { %v1362_v49 = vpop.eup %1361 }
 0xbf4   :  { %v656_v52 = vmul.f32 %v1362_v49, %v566_v36 }
 0xc57   :  { %v659_v50 = vpop.permute.xlu0 %658 }
 0xc58   :  { %v661_v51 = vmul.f32 %v1362_v49, %v659_v50  ;;  %v977_v50 = vld [vmem:[%s1623_s4 + $0x18] sm:$0xff] }
 0xc5a   :  { %663 = vrot.lane.b32.xlu1 %v661_v51, %s1392_s13  ;;  %v1318_v51 = vpack.c.bf16 %v977_v50, %v976_v48 }
 0xccc   :  { %v664_v53 = vpop.permute.xlu1 %663 }
 0xccd   :  { %v666_v54 = vadd.f32 %v664_v53, %v656_v52 }
 0xccf   :  { %1363 = vtanh.f32 %v666_v54 }
 0xcd9   :  { %v1364_v55 = vpop.eup %1363 }
 0xcda   :  { %669 = vrot.lane.b32.xlu0 %v1364_v55, %s1392_s13 }
 0xd4c   :  { %v670_v56 = vpop.permute.xlu0 %669 }
 0xd4d   :  { %v672_v57 = vmul.f32 %v1362_v49, %v670_v56  ;;  %v1315_v49 = vpack.c.bf16 %v975_v47, %v974_v61 }
 0xd4f   :  { %674 = vrot.lane.b32.xlu1 %v672_v57, %s1393_s3  ;;  %v1090_v57 = vld [vmem:[%s1624_s5] ss:$0 sm:$0xff] }
 0xdc1   :  { %v675_v58 = vpop.permute.xlu1 %674 }
 0xdc2   :  { %1227 = vmatmul.mubr.msk.f32.vlgmr.msra.gmra.mrb[6].mxu1 %vm174_vm2, %v675_v58 }
 0xdc3   :  { %1310 = vmatpush3.bf16.msra.mxu1 %v1447_v8  ;;  %1248 = vmatprep.mubr.msk.f32.mxu1 %vm1390_vm1, %v1391_v4 }
 0xdc4   :  { %1311 = vmatprep.subr.bf16.mxu1 %v1389_v0 }
 0xdc7   :  { %1313 = vmatpush3.bf16.msra.mxu1 %v1460_v12 }
 0xe95   :  { %v744_v63 = vpop.f32.mrb[6].mxu1 }
 0xe96   :  { %v748_v1 = vadd.f32 %v744_v63, %v157_v60  ;;  %v1228_v2 = vpop.f32.mrb[7].mxu1 }
 0xe98   :  { %1365 = vtanh.f32 %v748_v1  ;;  %v1085_v5 = vmul.f32 -1.442695, %v748_v1 }
 0xe9a   :  { %1367 = vpow2.f32 %v1085_v5 }
 0xea2   :  { %v1366_v3 = vpop.eup %1365 }
 0xea3   :  { %758 = vrot.lane.b32.xlu0 %v1366_v3, %s1392_s13 }
 0xea4   :  { %v1368_v8 = vpop.eup %1367 }
 0xea5   :  { %v752_v6 = vadd.f32 1.0, %v1368_v8 }
 0xea7   :  { %1369 = vrcp.f32 %v752_v6 }
 0xeb1   :  { %v1370_v7 = vpop.eup %1369 }
 0xeb2   :  { %v756_v12 = vmul.f32 %v1370_v7, %v666_v54 }
 0xf15   :  { %v759_v9 = vpop.permute.xlu0 %758 }
 0xf16   :  { %v761_v10 = vmul.f32 %v1370_v7, %v759_v9 }
 0xf18   :  { %763 = vrot.lane.b32.xlu1 %v761_v10, %s1392_s13 }
 0xf8a   :  { %v764_v11 = vpop.permute.xlu1 %763 }
 0xf8b   :  { %v766_v59 = vadd.f32 %v764_v11, %v756_v12 }
 0xf8d   :  { %1371 = vtanh.f32 %v766_v59 }
 0xf97   :  { %v1372_v14 = vpop.eup %1371 }
 0xf98   :  { %769 = vrot.lane.b32.xlu0 %v1372_v14, %s1392_s13 }
0x100a   :  { %v770_v15 = vpop.permute.xlu0 %769 }
0x100b   :  { %v772_v16 = vmul.f32 %v1370_v7, %v770_v15 }
0x100d   :  { %774 = vrot.lane.b32.xlu1 %v772_v16, %s1393_s3 }
0x107f   :  { %v775_v17 = vpop.permute.xlu1 %774 }
0x1080   :  { %1238 = vmatmul.mubr.msk.f32.vlgmr.msra.gmra.mrb[12].mxu0 %vm174_vm2, %v775_v17 }
0x1081   :  { %1259 = vmatprep.mubr.msk.f32.mxu0 %vm1390_vm1, %v1391_v4  ;;  %1316 = vmatpush3.bf16.msra.mxu0 %v1315_v49 }
0x1082   :  { %1317 = vmatprep.subr.bf16.mxu0 %v1389_v0 }
0x1085   :  { %1319 = vmatpush3.bf16.msra.mxu0 %v1318_v51 }
0x1153   :  { %v844_v19 = vpop.f32.mrb[12].mxu0 }
0x1154   :  { %v848_v20 = vadd.f32 %v844_v19, %v162_v18  ;;  %v1239_v21 = vpop.f32.mrb[13].mxu0 }
0x1156   :  { %1373 = vtanh.f32 %v848_v20  ;;  %v1087_v23 = vmul.f32 -1.442695, %v848_v20 }
0x1158   :  { %1375 = vpow2.f32 %v1087_v23 }
0x1160   :  { %v1374_v22 = vpop.eup %1373 }
0x1161   :  { %858 = vrot.lane.b32.xlu0 %v1374_v22, %s1392_s13 }
0x1162   :  { %v1376_v24 = vpop.eup %1375 }
0x1163   :  { %v852_v25 = vadd.f32 1.0, %v1376_v24 }
0x1165   :  { %1377 = vrcp.f32 %v852_v25 }
0x116f   :  { %v1378_v26 = vpop.eup %1377 }
0x1170   :  { %v856_v4 = vmul.f32 %v1378_v26, %v766_v59 }
0x11d3   :  { %v859_v27 = vpop.permute.xlu0 %858 }
0x11d4   :  { %v861_v28 = vmul.f32 %v1378_v26, %v859_v27 }
0x11d6   :  { %863 = vrot.lane.b32.xlu1 %v861_v28, %s1392_s13 }
0x1248   :  { %v864_v29 = vpop.permute.xlu1 %863 }
0x1249   :  { %v866_v62 = vadd.f32 %v864_v29, %v856_v4 }
0x124b   :  { %1379 = vtanh.f32 %v866_v62 }
0x1255   :  { %v1380_v30 = vpop.eup %1379 }
0x1256   :  { %869 = vrot.lane.b32.xlu0 %v1380_v30, %s1392_s13 }
0x12c8   :  { %v870_v31 = vpop.permute.xlu0 %869 }
0x12c9   :  { %v872_v32 = vmul.f32 %v1378_v26, %v870_v31 }
0x12cb   :  { %874 = vrot.lane.b32.xlu1 %v872_v32, %s1393_s3 }
0x133d   :  { %v875_v33 = vpop.permute.xlu1 %874 }
0x133e   :  { %1249 = vmatmul.mubr.msk.f32.vlgmr.msra.gmra.mrb[8].mxu1 %vm174_vm2, %v875_v33 }
0x1411   :  { %v944_v35 = vpop.f32.mrb[8].mxu1 }
0x1412   :  { %v948_v36 = vadd.f32 %v944_v35, %v167_v34  ;;  %v1250_v37 = vpop.f32.mrb[9].mxu1 }
0x1414   :  { %1381 = vtanh.f32 %v948_v36  ;;  %v1089_v39 = vmul.f32 -1.442695, %v948_v36 }
0x1416   :  { %1383 = vpow2.f32 %v1089_v39 }
0x141e   :  { %v1382_v38 = vpop.eup %1381 }
0x141f   :  { %958 = vrot.lane.b32.xlu0 %v1382_v38, %s1392_s13 }
0x1420   :  { %v1384_v40 = vpop.eup %1383 }
0x1421   :  { %v952_v41 = vadd.f32 1.0, %v1384_v40 }
0x1423   :  { %1385 = vrcp.f32 %v952_v41 }
0x142d   :  { %v1386_v42 = vpop.eup %1385 }
0x142e   :  { %v956_v45 = vmul.f32 %v1386_v42, %v866_v62 }
0x1491   :  { %v959_v43 = vpop.permute.xlu0 %958 }
0x1492   :  { %v961_v44 = vmul.f32 %v1386_v42, %v959_v43 }
0x1494   :  { %963 = vrot.lane.b32.xlu1 %v961_v44, %s1392_s13 }
0x1506   :  { %v964_v46 = vpop.permute.xlu1 %963 }
0x1507   :  { %v966_v13 = vadd.f32 %v964_v46, %v956_v45 }
0x1509   :  { %1387 = vtanh.f32 %v966_v13 }
0x1513   :  { %v1388_v52 = vpop.eup %1387 }
0x1514   :  { %969 = vrot.lane.b32.xlu0 %v1388_v52, %s1392_s13 }
0x1586   :  { %v970_v53 = vpop.permute.xlu0 %969 }
0x1587   :  { %v972_v54 = vmul.f32 %v1386_v42, %v970_v53 }
0x1589   :  { %v973_v55 = vmax.f32 %v972_v54, 0.0 }
0x158b   :  { %986 = vrot.lane.b32.xlu1 %v973_v55, %s1393_s3 }
0x15fd   :  { %v987_v56 = vpop.permute.xlu1 %986 }
0x15fe   :  { %1260 = vmatmul.mubr.msk.f32.vlgmr.msra.gmra.mrb[14].mxu0 %vm174_vm2, %v987_v56 }
0x16d1   :  { %v1056_v58 = vpop.f32.mrb[14].mxu0 }
0x16d2   :  { %v1057_v60 = vadd.f32 %v1090_v57, %v1056_v58  ;;  %v1261_v0 = vpop.f32.mrb[15].mxu0 }
0x16d4   :  { %1061 = vst.msk [vmem:[%s1625_s6] sm:$0xff] %vm1060_vm3, %v1057_v60 }

</bundles_post_ra>
